<compile_context>
chip_gen: v6e
topology: v6e:2x2x1
jax: 0.10.0
libtpu: 0.0.40
codegen_flags: <defaults>
</compile_context>

<pallas_src>
import functools

import jax
import jax.numpy as jnp
from jax.experimental import pallas as pl
from jax.experimental.pallas import tpu as pltpu


def _round_up(x, m):
    return ((x + m - 1) // m) * m


def flatten_box_features(x):
    """Mirror of the PyTorch helper: (N, C, 1, 1) -> (N, C); (N, C) passthrough."""
    if x.ndim == 4:
        assert x.shape[2] == 1 and x.shape[3] == 1, "expected 1x1 pooled features"
        return x.reshape(x.shape[0], x.shape[1])
    return x


def prepare_fused_params(params, compute_dtype=jnp.bfloat16):
    """One-time fusion/padding of the three Linear heads (hoisted off the call path).

    params (PyTorch-transposed layout, y = x @ W + b):
      w_cls (C, num_classes),   b_cls (num_classes,)
      w_box (C, num_classes*4), b_box (num_classes*4,)
      w_id  (C, id_dim),        b_id  (id_dim,)
    """
    c, num_classes = params["w_cls"].shape
    num_box_out = params["w_box"].shape[1]
    id_dim = params["w_id"].shape[1]
    det_out = num_classes + num_box_out
    det_pad = _round_up(det_out, 128)
    id_pad = _round_up(id_dim, 128)

    # Fused [cls | box | 0-pad] detection weights, and 0-padded id weights.
    w_det = jnp.zeros((c, det_pad), compute_dtype)
    w_det = w_det.at[:, :num_classes].set(params["w_cls"].astype(compute_dtype))
    w_det = w_det.at[:, num_classes:det_out].set(params["w_box"].astype(compute_dtype))
    w_id = jnp.zeros((c, id_pad), compute_dtype)
    w_id = w_id.at[:, :id_dim].set(params["w_id"].astype(compute_dtype))
    # Fully fused weights for the shared-feature fast path.
    w_all = jnp.concatenate([w_det, w_id], axis=1)

    b_all = jnp.zeros((1, det_pad + id_pad), jnp.float32)
    b_all = b_all.at[0, :num_classes].set(params["b_cls"].astype(jnp.float32))
    b_all = b_all.at[0, num_classes:det_out].set(params["b_box"].astype(jnp.float32))
    b_all = b_all.at[0, det_pad:det_pad + id_dim].set(params["b_id"].astype(jnp.float32))

    return {
        "w_det": w_det, "w_id": w_id, "w_all": w_all, "b_all": b_all,
        "c": c, "num_classes": num_classes, "det_out": det_out, "id_dim": id_dim,
        "det_pad": det_pad, "id_pad": id_pad, "compute_dtype": compute_dtype,
    }


def _two_stream_kernel(det_pad, compute_dtype,
                       xd_ref, xr_ref, w_det_ref, w_id_ref, b_ref, out_ref):
    # In-kernel bf16 cast (no standalone XLA cast pass); f32 accumulation.
    xd = xd_ref[...].astype(compute_dtype)
    xr = xr_ref[...].astype(compute_dtype)
    det = jnp.dot(xd, w_det_ref[...], preferred_element_type=jnp.float32)
    ide = jnp.dot(xr, w_id_ref[...], preferred_element_type=jnp.float32)
    # 128-aligned lane slices -> unmasked stores into the single fused output.
    out_ref[:, :det_pad] = (det + b_ref[:, :det_pad]).astype(out_ref.dtype)
    out_ref[:, det_pad:] = (ide + b_ref[:, det_pad:]).astype(out_ref.dtype)


def _shared_stream_kernel(compute_dtype, x_ref, w_ref, b_ref, out_ref):
    x = x_ref[...].astype(compute_dtype)
    out_ref[...] = (
        jnp.dot(x, w_ref[...], preferred_element_type=jnp.float32) + b_ref[...]
    ).astype(out_ref.dtype)


def _const_spec(shape):
    """BlockSpec for a grid-invariant operand; single-buffered when supported."""
    index_map = lambda i: (0,) * len(shape)
    try:
        return pl.BlockSpec(shape, index_map, pipeline_mode=pl.Buffered(1))
    except (TypeError, AttributeError):
        return pl.BlockSpec(shape, index_map)


def fast_rcnn_predictor_with_id(
    box_features_detect,
    box_features_recog,
    params,
    *,
    block_n=512,            # max row tile (512 keeps v7x VMEM happy; v5e/v6e may raise)
    min_grid_steps=2,       # >=2 grid steps when N allows -> both v7x TensorCores
    out_dtype=jnp.float32,
    vmem_budget_bytes=40 << 20,
):
    """Runs the three linear heads of FastRCNNPredictorWithID in one Pallas kernel."""
    # Shared-feature fast path: same array for detect & recog -> one feature stream.
    shared = box_features_detect is box_features_recog

    xd = flatten_box_features(box_features_detect)
    xr = xd if shared else flatten_box_features(box_features_recog)
    n, c = xd.shape
    assert xr.shape == (n, c), "detect/recog feature batches must match"

    fp = params if "w_all" in params else prepare_fused_params(params)
    assert fp["c"] == c, "feature width does not match prepared params"
    num_classes, det_out, id_dim = fp["num_classes"], fp["det_out"], fp["id_dim"]
    det_pad, id_pad = fp["det_pad"], fp["id_pad"]
    lanes = det_pad + id_pad
    compute_dtype = fp["compute_dtype"]

    if n == 0:
        return (jnp.zeros((0, num_classes), out_dtype),
                jnp.zeros((0, det_out - num_classes), out_dtype),
                jnp.zeros((0, id_dim), out_dtype))

    # ---- Row tiling: no N padding; ragged last block handled by Pallas masking. ----
    assert block_n % 16 == 0, "row tile must be a multiple of 16 (bf16 sublane packing)"
    num_tiles = pl.cdiv(n, block_n)
    if n >= 16 * min_grid_steps:
        num_tiles = max(num_tiles, min_grid_steps)
    tile_n = min(block_n, _round_up(pl.cdiv(n, num_tiles), 16))

    feat_itemsize = jnp.dtype(xd.dtype).itemsize
    w_itemsize = jnp.dtype(compute_dtype).itemsize
    out_itemsize = jnp.dtype(out_dtype).itemsize
    n_streams = 1 if shared else 2

    def vmem_need(t):
        return (n_streams * 2 * t * c * feat_itemsize      # double-buffered feature streams
                + c * lanes * w_itemsize + lanes * 4        # weights + bias (single-buffered)
                + 2 * t * lanes * out_itemsize)             # double-buffered fused output

    # Shrink the row tile if the working set exceeds the budget (keeps us inside
    # v7x's 64 MiB physical VMEM; v5e/v6e at 128 MiB have headroom).
    while tile_n > 16 and vmem_need(tile_n) > vmem_budget_bytes:
        tile_n = _round_up(tile_n // 2, 16)
    # Note: for huge C (e.g. 7*7*256) even tile_n=16 can overflow; that case
    # would need K-tiling over C with an f32 VMEM accumulator.

    grid = (pl.cdiv(n, tile_n),)
    vmem_limit = int(min(64 << 20, max(32 << 20, vmem_need(tile_n) + (8 << 20))))

    cost = pl.CostEstimate(
        flops=2 * n * c * lanes,
        transcendentals=0,
        bytes_accessed=(n_streams * n * c * feat_itemsize
                        + c * lanes * w_itemsize + lanes * 4
                        + n * lanes * out_itemsize),
    )

    feat_spec = pl.BlockSpec((tile_n, c), lambda i: (i, 0))
    out_spec = pl.BlockSpec((tile_n, lanes), lambda i: (i, 0))
    compiler_params = pltpu.CompilerParams(
        dimension_semantics=("parallel",), vmem_limit_bytes=vmem_limit)
    out_shape = jax.ShapeDtypeStruct((n, lanes), out_dtype)

    if shared:
        out = pl.pallas_call(
            functools.partial(_shared_stream_kernel, compute_dtype),
            out_shape=out_shape,
            grid=grid,
            in_specs=[feat_spec, _const_spec((c, lanes)), _const_spec((1, lanes))],
            out_specs=out_spec,
            compiler_params=compiler_params,
            cost_estimate=cost,
        )(xd, fp["w_all"], fp["b_all"])
    else:
        out = pl.pallas_call(
            functools.partial(_two_stream_kernel, det_pad, compute_dtype),
            out_shape=out_shape,
            grid=grid,
            in_specs=[feat_spec, feat_spec,
                      _const_spec((c, det_pad)), _const_spec((c, id_pad)),
                      _const_spec((1, lanes))],
            out_specs=out_spec,
            compiler_params=compiler_params,
            cost_estimate=cost,
        )(xd, xr, fp["w_det"], fp["w_id"], fp["b_all"])

    scores = out[:, :num_classes]
    bbox_deltas = out[:, num_classes:det_out]
    id_embeddings = out[:, det_pad:det_pad + id_dim]
    return scores, bbox_deltas, id_embeddings


def init_params(key, in_channels, id_embedding_size, num_classes=2):
    """Deterministic synthetic init matching nn.Linear parameter shapes (transposed)."""
    ks = jax.random.split(key, 6)
    scale = 1.0 / jnp.sqrt(jnp.float32(in_channels))
    return {
        "w_cls": jax.random.uniform(ks[0], (in_channels, num_classes), jnp.float32, -scale, scale),
        "b_cls": jax.random.uniform(ks[1], (num_classes,), jnp.float32, -scale, scale),
        "w_box": jax.random.uniform(ks[2], (in_channels, num_classes * 4), jnp.float32, -scale, scale),
        "b_box": jax.random.uniform(ks[3], (num_classes * 4,), jnp.float32, -scale, scale),
        "w_id": jax.random.uniform(ks[4], (in_channels, id_embedding_size), jnp.float32, -scale, scale),
        "b_id": jax.random.uniform(ks[5], (id_embedding_size,), jnp.float32, -scale, scale),
    }


if __name__ == "__main__":
    key = jax.random.PRNGKey(0)
    k_in, k_params = jax.random.split(key)

    in_channels = 32
    id_embedding_size = 16
    num_classes = 2

    params = init_params(k_params, in_channels, id_embedding_size, num_classes)
    fused = prepare_fused_params(params)   # hoisted one-time weight fusion

    def _rd(a):  # bf16-rounded operands, f32 accumulation (matches kernel compute)
        return a.astype(jnp.bfloat16).astype(jnp.float32)

    # --- Test 1: distinct detect/recog features, ragged N (not a multiple of 16) ---
    num_boxes = 20
    k_det, k_rec, k_shared = jax.random.split(k_in, 3)
    box_features_detect = jax.random.normal(k_det, (num_boxes, in_channels, 1, 1), jnp.float32)
    box_features_recog = jax.random.normal(k_rec, (num_boxes, in_channels), jnp.float32)

    scores, bbox_deltas, id_embeddings = fast_rcnn_predictor_with_id(
        box_features_detect, box_features_recog, fused)
    jax.block_until_ready((scores, bbox_deltas, id_embeddings))

    xd = _rd(box_features_detect.reshape(num_boxes, in_channels))
    xr = _rd(box_features_recog)
    ref_scores = xd @ _rd(params["w_cls"]) + params["b_cls"]
    ref_bbox = xd @ _rd(params["w_box"]) + params["b_box"]
    ref_id = xr @ _rd(params["w_id"]) + params["b_id"]

    assert scores.shape == (num_boxes, num_classes)
    assert bbox_deltas.shape == (num_boxes, num_classes * 4)
    assert id_embeddings.shape == (num_boxes, id_embedding_size)
    assert jnp.allclose(scores, ref_scores, atol=2e-2, rtol=2e-2)
    assert jnp.allclose(bbox_deltas, ref_bbox, atol=2e-2, rtol=2e-2)
    assert jnp.allclose(id_embeddings, ref_id, atol=2e-2, rtol=2e-2)

    # --- Test 2: shared detect/recog features (fast path), multi-step grid ---
    num_boxes2 = 64
    box_features_shared = jax.random.normal(k_shared, (num_boxes2, in_channels), jnp.float32)
    s2, b2, i2 = fast_rcnn_predictor_with_id(
        box_features_shared, box_features_shared, fused)
    jax.block_until_ready((s2, b2, i2))

    xs = _rd(box_features_shared)
    assert jnp.allclose(s2, xs @ _rd(params["w_cls"]) + params["b_cls"], atol=2e-2, rtol=2e-2)
    assert jnp.allclose(b2, xs @ _rd(params["w_box"]) + params["b_box"], atol=2e-2, rtol=2e-2)
    assert jnp.allclose(i2, xs @ _rd(params["w_id"]) + params["b_id"], atol=2e-2, rtol=2e-2)

    print("KERNEL_OK")
</pallas_src>

<mosaic_0001>
module attributes {stable_mosaic.version = 11 : i64} {
  func.func @_two_stream_kernel(%arg0: i32, %arg1: memref<32x32xf32, #tpu.memory_space<vmem>>, %arg2: memref<32x32xf32, #tpu.memory_space<vmem>>, %arg3: memref<32x128xbf16, #tpu.memory_space<vmem>>, %arg4: memref<32x128xbf16, #tpu.memory_space<vmem>>, %arg5: memref<1x256xf32, #tpu.memory_space<vmem>>, %arg6: memref<32x256xf32, #tpu.memory_space<vmem>>) attributes {dimension_semantics = [#tpu.dimension_semantics<parallel>], iteration_bounds = array<i64: 1>, scalar_prefetch = 0 : i64, scratch_operands = 0 : i64, tpu.core_type = #tpu.core_type<tc>, window_params = [{transform_indices = @transform_0, window_bounds = array<i64: 32, 32>}, {transform_indices = @transform_1, window_bounds = array<i64: 32, 32>}, {pipeline_mode = #tpu.pipeline_mode<synchronous>, transform_indices = @transform_2, window_bounds = array<i64: 32, 128>}, {pipeline_mode = #tpu.pipeline_mode<synchronous>, transform_indices = @transform_3, window_bounds = array<i64: 32, 128>}, {pipeline_mode = #tpu.pipeline_mode<synchronous>, transform_indices = @transform_4, window_bounds = array<i64: 1, 256>}, {transform_indices = @transform_5, window_bounds = array<i64: 32, 256>}]} {
    %c0 = arith.constant 0 : index
    %c0_0 = arith.constant 0 : index
    %0 = vector.load %arg1[%c0, %c0_0] : memref<32x32xf32, #tpu.memory_space<vmem>>, vector<32x32xf32>
    %1 = arith.truncf %0 : vector<32x32xf32> to vector<32x32xbf16>
    %c0_1 = arith.constant 0 : index
    %c0_2 = arith.constant 0 : index
    %2 = vector.load %arg2[%c0_1, %c0_2] : memref<32x32xf32, #tpu.memory_space<vmem>>, vector<32x32xf32>
    %3 = arith.truncf %2 : vector<32x32xf32> to vector<32x32xbf16>
    %c0_3 = arith.constant 0 : index
    %c0_4 = arith.constant 0 : index
    %4 = vector.load %arg3[%c0_3, %c0_4] : memref<32x128xbf16, #tpu.memory_space<vmem>>, vector<32x128xbf16>
    %cst = arith.constant dense<0.000000e+00> : vector<32x128xf32>
    %5 = tpu.matmul %1, %4, %cst {dimension_numbers = #tpu.dot_dimension_numbers<[1], [0], [0], [1], [0, 0, 1, 1], [], []>} : vector<32x32xbf16>, vector<32x128xbf16>, vector<32x128xf32> -> vector<32x128xf32>
    %c0_5 = arith.constant 0 : index
    %c0_6 = arith.constant 0 : index
    %6 = vector.load %arg4[%c0_5, %c0_6] : memref<32x128xbf16, #tpu.memory_space<vmem>>, vector<32x128xbf16>
    %cst_7 = arith.constant dense<0.000000e+00> : vector<32x128xf32>
    %7 = tpu.matmul %3, %6, %cst_7 {dimension_numbers = #tpu.dot_dimension_numbers<[1], [0], [0], [1], [0, 0, 1, 1], [], []>} : vector<32x32xbf16>, vector<32x128xbf16>, vector<32x128xf32> -> vector<32x128xf32>
    %c0_8 = arith.constant 0 : index
    %c0_9 = arith.constant 0 : index
    %8 = vector.load %arg5[%c0_8, %c0_9] : memref<1x256xf32, #tpu.memory_space<vmem>>, vector<1x128xf32>
    %9 = vector.broadcast %8 : vector<1x128xf32> to vector<32x128xf32>
    %10 = arith.addf %5, %9 : vector<32x128xf32>
    %c0_10 = arith.constant 0 : index
    %c0_11 = arith.constant 0 : index
    %11 = vector.load %arg6[%c0_10, %c0_11] : memref<32x256xf32, #tpu.memory_space<vmem>>, vector<32x128xf32>
    tpu.vector_store %arg6[%c0_10, %c0_11], %10 {strides = array<i32>} : memref<32x256xf32, #tpu.memory_space<vmem>>, vector<32x128xf32>,
    %c0_12 = arith.constant 0 : index
    %c128 = arith.constant 128 : index
    %12 = vector.load %arg5[%c0_12, %c128] : memref<1x256xf32, #tpu.memory_space<vmem>>, vector<1x128xf32>
    %13 = vector.broadcast %12 : vector<1x128xf32> to vector<32x128xf32>
    %14 = arith.addf %7, %13 : vector<32x128xf32>
    %c0_13 = arith.constant 0 : index
    %c128_14 = arith.constant 128 : index
    %15 = vector.load %arg6[%c0_13, %c128_14] : memref<32x256xf32, #tpu.memory_space<vmem>>, vector<32x128xf32>
    tpu.vector_store %arg6[%c0_13, %c128_14], %14 {strides = array<i32>} : memref<32x256xf32, #tpu.memory_space<vmem>>, vector<32x128xf32>,
    return
  }
  func.func @transform_0(%arg0: i32) -> (i32, i32) {
    %c0_i32 = arith.constant 0 : i32
    %c0_i32_0 = arith.constant 0 : i32
    return %arg0, %c0_i32 : i32, i32
  }
  func.func @transform_1(%arg0: i32) -> (i32, i32) {
    %c0_i32 = arith.constant 0 : i32
    %c0_i32_0 = arith.constant 0 : i32
    return %arg0, %c0_i32 : i32, i32
  }
  func.func @transform_2(%arg0: i32) -> (i32, i32) {
    %c0_i32 = arith.constant 0 : i32
    %c0_i32_0 = arith.constant 0 : i32
    %c0_i32_1 = arith.constant 0 : i32
    return %c0_i32, %c0_i32_0 : i32, i32
  }
  func.func @transform_3(%arg0: i32) -> (i32, i32) {
    %c0_i32 = arith.constant 0 : i32
    %c0_i32_0 = arith.constant 0 : i32
    %c0_i32_1 = arith.constant 0 : i32
    return %c0_i32, %c0_i32_0 : i32, i32
  }
  func.func @transform_4(%arg0: i32) -> (i32, i32) {
    %c0_i32 = arith.constant 0 : i32
    %c0_i32_0 = arith.constant 0 : i32
    %c0_i32_1 = arith.constant 0 : i32
    return %c0_i32, %c0_i32_0 : i32, i32
  }
  func.func @transform_5(%arg0: i32) -> (i32, i32) {
    %c0_i32 = arith.constant 0 : i32
    %c0_i32_0 = arith.constant 0 : i32
    return %arg0, %c0_i32 : i32, i32
  }
}

</mosaic_0001>

<bundles_post_ra>
// kernel: tpu_custom_call.1
= control target key start
LH: loop header
LB: loop body
LE: loop exit
PB: predicated region body
PF: predicated region fallthrough
CT: control target
= control target key end

     0   :  { %10 = vsyncpa [#allocation3], 0  ;;  %s496_s0 = inlined_call_operand.hbm [shape: f32[20,32], index: 0, kind: input, shape index: {}]   ;;  %s497_s1 = inlined_call_operand.hbm [shape: f32[20,32], index: 1, kind: input, shape index: {}]   ;;  %s498_s2 = inlined_call_operand.hbm [shape: bf16[32,128], index: 2, kind: input, shape index: {}]   ;;  %s499_s3 = inlined_call_operand.hbm [shape: bf16[32,128], index: 3, kind: input, shape index: {}]   ;;  %s500_s4 = inlined_call_operand.vmem [shape: f32[1,256], index: 4, kind: input, shape index: {}]   ;;  %s501_s5 = inlined_call_operand.hbm [shape: f32[20,256], index: 5, kind: output, shape index: {}]  }
   0x1   :  { %11 = vsyncpa [#allocation6], 0 }
   0x2   :  { %12 = vsyncpa [#allocation9], 0 }
   0x3   :  { %13 = vsyncpa [#allocation4], 0 }
   0x4   :  { %18 = vsyncadd [#allocation3], 128  ;;  %s430_s18 = smov [#allocation2]  }
   0x5   :  { %s19_s19 = sshll.u32 %s430_s18, 4  ;;  %s20_s19 = int_to_ptr.vmem [resolvable:$true] %s19_s19 }
   0x6   :  { %s330_s20 = scalar_lea.vmem %s20_s19, 384  ;;  %s334_s21 = scalar_lea.vmem %s20_s19, 512 }
   0x7   :  { %p331_p0 = scmp.ne.s32.totalorder %s20_s19, %s330_s20  ;;  %p335_p1 = scmp.lt.s32.totalorder %s20_s19, %s20_s19 }
   0x8   :  { %p336_p2 = scmp.lt.s32.totalorder %s334_s21, %s330_s20 }
   0xa   :  { %p337_p3 = por %p336_p2, %p335_p1 }
   0xc   :  { %p338_p4 = pnand %p337_p3, %p331_p0 }
   0xe   :  { %341 = shalt.err (!%p338_p4)
}
   0xf   :  { %s431_s22 = smov 128   ;;  %s432_s23 = smov 8  }
  0x10   :  { %25 = dma.hbm_to_vmem [thread:$0]  %s496_s0, 384, %s20_s19, [#allocation3], %s431_s22, %s431_s22, %s432_s23  }
  0x11   :  { %30 = vsyncadd [#allocation6], 128  ;;  %s433_s26 = smov [#allocation5]   ;;  %s434_s28 = smov [#allocation7]  }
  0x12   :  { %s31_s27 = sshll.u32 %s433_s26, 4  ;;  %s43_s29 = sshll.u32 %s434_s28, 4  ;;  %s32_s27 = int_to_ptr.vmem [resolvable:$true] %s31_s27  ;;  %s44_s29 = int_to_ptr.vmem [resolvable:$true] %s43_s29 }
  0x13   :  { %s350_s30 = scalar_lea.vmem %s32_s27, 384  ;;  %s354_s6 = scalar_lea.vmem %s32_s27, 512 }
  0x14   :  { %p351_p5 = scmp.ne.s32.totalorder %s32_s27, %s350_s30  ;;  %p355_p6 = scmp.lt.s32.totalorder %s32_s27, %s32_s27 }
  0x15   :  { %p356_p7 = scmp.lt.s32.totalorder %s354_s6, %s350_s30 }
  0x17   :  { %p357_p8 = por %p356_p7, %p355_p6 }
  0x19   :  { %p358_p9 = pnand %p357_p8, %p351_p5 }
  0x1b   :  { %361 = shalt.err (!%p358_p9)
}
  0x1c   :  { %37 = dma.hbm_to_vmem [thread:$0]  %s497_s1, 384, %s32_s27, [#allocation6], %s431_s22, %s431_s22, %s432_s23  }
  0x1d   :  { %s370_s0 = scalar_lea.vmem %s44_s29, 256  ;;  %p375_p11 = scmp.lt.s32.totalorder %s44_s29, %s44_s29 }
  0x1e   :  { %p371_p10 = scmp.ne.s32.totalorder %s44_s29, %s370_s0  ;;  %p376_p12 = scmp.lt.s32.totalorder %s370_s0, %s370_s0 }
  0x20   :  { %p377_p13 = por %p376_p12, %p375_p11 }
  0x22   :  { %p378_p0 = pnand %p377_p13, %p371_p10 }
  0x24   :  { %381 = shalt.err (!%p378_p0)
}
  0x25   :  { %s435_s9 = smov 64   ;;  %s436_s10 = smov 4  }
  0x26   :  { %49 = dma.hbm_to_vmem [thread:$0]  %s498_s2, 256, %s44_s29, [#allocation6], %s435_s9, %s435_s9, %s436_s10  }
  0x27   :  { %s437_s13 = smov [#allocation8]  }
  0x28   :  { %s55_s14 = sshll.u32 %s437_s13, 4  ;;  %s56_s14 = int_to_ptr.vmem [resolvable:$true] %s55_s14 }
  0x29   :  { %s390_s15 = scalar_lea.vmem %s56_s14, 256  ;;  %p395_p2 = scmp.lt.s32.totalorder %s56_s14, %s56_s14 }
  0x2a   :  { %p391_p1 = scmp.ne.s32.totalorder %s56_s14, %s390_s15  ;;  %p396_p3 = scmp.lt.s32.totalorder %s390_s15, %s390_s15 }
  0x2c   :  { %p397_p4 = por %p396_p3, %p395_p2 }
  0x2e   :  { %p398_p5 = pnand %p397_p4, %p391_p1 }
  0x30   :  { %401 = shalt.err (!%p398_p5)
}
  0x31   :  { %61 = dma.hbm_to_vmem [thread:$0]  %s499_s3, 256, %s56_s14, [#allocation9], %s435_s9, %s435_s9, %s436_s10  }
  0x32   :  { %422 = dma.done.wait [#allocation3], 512  }
  0x33   :  { %423 = vsyncadd [#allocation3], 4294966784 }
  0x34   :  { %424 = dma.done.wait [#allocation6], 768  }
  0x35   :  { %425 = vsyncadd [#allocation6], 4294966528 }
  0x36   :  { %426 = dma.done.wait [#allocation9], 256  }
  0x37   :  { %427 = vsyncadd [#allocation9], 4294967040  ;;  %v318_v0 = vld [vmem:[#allocation7 + $0x8] sm:$0xff]   ;;  %v319_v1 = vld [vmem:[#allocation8 + $0x8] sm:$0xff]   ;;  %vm116_vm0 = vcmask 261120  }
  0x38   :  { %291 = vmatprep.subr.bf16.mxu0 %v318_v0  ;;  %v320_v2 = vld [vmem:[#allocation7] sm:$0xff]   ;;  %299 = vmatprep.subr.bf16.mxu1 %v319_v1  ;;  %v321_v3 = vld [vmem:[#allocation8] sm:$0xff]   ;;  %v78_v5 = vld [vmem:[#allocation2 + $0x8] sm:$0xff] }
  0x39   :  { %292 = vmatpush3.bf16.msra.mxu0 %v318_v0  ;;  %300 = vmatpush3.bf16.msra.mxu1 %v319_v1  ;;  %v77_v4 = vld [vmem:[#allocation2] sm:$0xff]  ;;  %v84_v8 = vld [vmem:[#allocation5 + $0x8] sm:$0xff]  ;;  %v79_v9 = vld [vmem:[#allocation2 + $0x10] sm:$0xff] }
  0x3a   :  { %293 = vmatprep.subr.bf16.mxu0 %v320_v2  ;;  %v83_v6 = vld [vmem:[#allocation5] sm:$0xff]  ;;  %301 = vmatprep.subr.bf16.mxu1 %v321_v3  ;;  %v81_v7 = vpack.c.bf16 %v78_v5, %v77_v4  ;;  %v80_v10 = vld [vmem:[#allocation2 + $0x18] sm:$0xff]  ;;  %v85_v13 = vld [vmem:[#allocation5 + $0x10] sm:$0xff] }
  0x3b   :  { %v87_v11 = vpack.c.bf16 %v84_v8, %v83_v6  ;;  %v82_v12 = vpack.c.bf16 %v80_v10, %v79_v9  ;;  %v86_v14 = vld [vmem:[#allocation5 + $0x18] sm:$0xff]  ;;  %v273_v16 = vld [vmem:[%s500_s4] ss:$0 sm:$0xff]  ;;  %v278_v17 = vld [vmem:[%s500_s4 + $0x1] ss:$0 sm:$0xff] }
  0x3c   :  { %295 = vmatprep.mubr.msk.bf16.mxu0 %vm116_vm0, %v81_v7  ;;  %v88_v15 = vpack.c.bf16 %v86_v14, %v85_v13 }
  0x3d   :  { %294 = vmatpush3.bf16.msra.mxu0 %v320_v2  ;;  %302 = vmatpush3.bf16.msra.mxu1 %v321_v3 }
  0x3e   :  { %303 = vmatprep.mubr.msk.bf16.mxu1 %vm116_vm0, %v87_v11 }
  0x40   :  { %296 = vmatmul.mubr.msk.bf16.vlgmr.msra.gmra.mxu0 %vm116_vm0, %v82_v12  ;;  %304 = vmatmul.mubr.msk.bf16.vlgmr.msra.gmra.mxu1 %vm116_vm0, %v88_v15 }
 0x100   :  { %v297_v18 = vpop.f32.mrf.mxu0  ;;  %v305_v20 = vpop.f32.mrf.mxu1 }
 0x101   :  { %v166_v19 = vadd.f32 %v297_v18, %v273_v16  ;;  %v244_v21 = vadd.f32 %v305_v20, %v278_v17 }
 0x102   :  { %v157_v22 = vpop.f32.mrf.mxu0  ;;  %v235_v24 = vpop.f32.mrf.mxu1 }
 0x103   :  { %174 = vst [vmem:[#allocation10 + $0x20] sm:$0xff] %v166_v19  ;;  %v158_v23 = vadd.f32 %v273_v16, %v157_v22  ;;  %252 = vst [vmem:[#allocation10 + $0x28] sm:$0xff] %v244_v21  ;;  %v236_v25 = vadd.f32 %v278_v17, %v235_v24 }
 0x104   :  { %v298_v26 = vpop.f32.mrf.mxu0  ;;  %v306_v28 = vpop.f32.mrf.mxu1 }
 0x105   :  { %172 = vst [vmem:[#allocation10] sm:$0xff] %v158_v23  ;;  %v169_v27 = vadd.f32 %v298_v26, %v273_v16  ;;  %250 = vst [vmem:[#allocation10 + $0x8] sm:$0xff] %v236_v25  ;;  %v247_v29 = vadd.f32 %v306_v28, %v278_v17 }
 0x106   :  { %v160_v30 = vpop.f32.mrf.mxu0  ;;  %v238_v32 = vpop.f32.mrf.mxu1 }
 0x107   :  { %175 = vst [vmem:[#allocation10 + $0x30] sm:$0xff] %v169_v27  ;;  %v161_v31 = vadd.f32 %v273_v16, %v160_v30  ;;  %253 = vst [vmem:[#allocation10 + $0x38] sm:$0xff] %v247_v29  ;;  %v239_v33 = vadd.f32 %v278_v17, %v238_v32 }
 0x109   :  { %173 = vst [vmem:[#allocation10 + $0x10] sm:$0xff] %v161_v31  ;;  %251 = vst [vmem:[#allocation10 + $0x18] sm:$0xff] %v239_v33 }
 0x10a   :  { %258 = vsyncadd [#allocation4], 256  ;;  %s438_s4 = smov [#allocation10]  }
 0x10b   :  { %s259_s19 = sshll.u32 %s438_s4, 4  ;;  %s260_s19 = int_to_ptr.vmem [resolvable:$true] %s259_s19 }
 0x10c   :  { %s402_s20 = scalar_lea.vmem %s260_s19, 768  ;;  %s406_s21 = scalar_lea.vmem %s260_s19, 1024 }
 0x10d   :  { %p403_p6 = scmp.ne.s32.totalorder %s260_s19, %s402_s20  ;;  %p407_p7 = scmp.lt.s32.totalorder %s260_s19, %s260_s19 }
 0x10e   :  { %p408_p8 = scmp.lt.s32.totalorder %s406_s21, %s402_s20 }
 0x110   :  { %p409_p9 = por %p408_p8, %p407_p7 }
 0x112   :  { %p410_p10 = pnand %p409_p9, %p403_p6 }
 0x114   :  { %413 = shalt.err (!%p410_p10)
}
 0x115   :  { %s439_s22 = smov 256   ;;  %s440_s23 = smov 16  }
 0x116   :  { %265 = dma.vmem_to_hbm [thread:$0]  %s260_s19, 768, %s501_s5, [#allocation4], %s439_s22, %s439_s22, %s440_s23  }
 0x117   :  { %428 = dma.done.wait [#allocation4], 1024  }
 0x118   :  { %429 = vsyncadd [#allocation4], 4294966272 }
 0x119   :  { %269 = vsyncpa [#allocation3], 1 }
 0x11a   :  { %270 = vsyncpa [#allocation6], 1 }
 0x11b   :  { %271 = vsyncpa [#allocation9], 1 }
 0x11c   :  { %272 = vsyncpa [#allocation4], 1 }

</bundles_post_ra>
